<compile_context>
chip_gen: v5e
topology: v5e:2x2
jax: 0.10.0
libtpu: 0.0.40
codegen_flags: <defaults>
</compile_context>

<pallas_src>
import functools

import jax
import jax.numpy as jnp
import numpy as np
from jax import lax
from jax.experimental import pallas as pl
from jax.experimental.pallas import tpu as pltpu


# ----------------------------------------------------------------------------
# Pallas kernel: one image (C, H*W) per grid step, fully fused SRU + CRU.
# ----------------------------------------------------------------------------
def scconv_kernel(x_ref, gmap_ref, gamma_ref, beta_ref,
                  w_s1_ref, w_s2_ref, w_gwc_ref, b_gwc_ref,
                  w_pwc1_ref, w_pwc2_ref, out_ref,
                  *, H, W, up_ch, ks, gate_threshold, eps):
    C = x_ref.shape[1]
    HW = H * W
    inv_hw = 1.0 / float(HW)
    Cu = up_ch
    Csq_up = w_s1_ref.shape[0]
    Csq_low = w_s2_ref.shape[0]
    Cm = C - Csq_low              # channels produced by PWC2
    Ch = C // 2                   # SRU reconstruct split
    pad = ks // 2

    x = x_ref[0].astype(jnp.float32)                       # (C, HW), f32 for VPU

    # ---------------- SRU: GroupNorm + sigmoid gate + reconstruct -----------
    gmap = gmap_ref[...]                                   # (C, C) group-average matrix
    g_mean = jnp.sum(jnp.dot(gmap, x, preferred_element_type=jnp.float32),
                     axis=1, keepdims=True) * inv_hw       # (C, 1) per-group mean
    g_ex2 = jnp.sum(jnp.dot(gmap, x * x, preferred_element_type=jnp.float32),
                    axis=1, keepdims=True) * inv_hw        # (C, 1) per-group E[x^2]
    inv_std = lax.rsqrt(g_ex2 - g_mean * g_mean + eps)     # (C, 1)
    gamma = gamma_ref[...]                                 # (C, 1)
    beta = beta_ref[...]
    gn = (x - g_mean) * inv_std * gamma + beta             # (C, HW)

    w_gamma = gamma / jnp.sum(gamma, axis=0, keepdims=True)
    z = gn * w_gamma
    rw = 1.0 / (1.0 + jnp.exp(-z))                         # sigmoid (EUP exp)
    w1 = jnp.where(rw > gate_threshold, jnp.ones_like(rw), rw)
    w2 = jnp.where(rw > gate_threshold, jnp.zeros_like(rw), rw)
    x1 = w1 * x
    x2 = w2 * x
    y_top = x1[:Ch, :] + x2[Ch:, :]                        # x_11 + x_22
    y_bot = x1[Ch:, :] + x2[:Ch, :]                        # x_12 + x_21

    if Cu == Ch:                                           # common alpha=0.5 case
        up_f32, low_f32 = y_top, y_bot
    else:
        y = jnp.concatenate([y_top, y_bot], axis=0)
        up_f32, low_f32 = y[:Cu, :], y[Cu:, :]

    # ---------------- CRU ----------------------------------------------------
    # squeeze1 / squeeze2 (1x1 convs, no bias): bf16 MXU matmuls, f32 accum.
    sq_up = jnp.dot(w_s1_ref[...], up_f32.astype(jnp.bfloat16),
                    preferred_element_type=jnp.float32)    # (Csq_up, HW)
    sq_low = jnp.dot(w_s2_ref[...], low_f32.astype(jnp.bfloat16),
                     preferred_element_type=jnp.float32)   # (Csq_low, HW)

    # GWC: ks x ks grouped conv (padding ks//2) as ONE fused im2col matmul.
    # Tap (ky, kx) = sq_up shifted by (pad-ky)*W + (pad-kx) along the flattened
    # HW lane axis with zero fill; row wrap-around is killed by a column mask
    # built from a 2-D iota.  No scratch, no reshapes.
    lane = lax.broadcasted_iota(jnp.int32, (1, HW), 1)
    if (W & (W - 1)) == 0:
        col = lane & (W - 1)
    else:
        col = lane % W
    taps = []
    for ky in range(ks):
        for kx in range(ks):
            s = (pad - ky) * W + (pad - kx)
            if s > 0:
                shifted = jnp.concatenate(
                    [jnp.zeros((Csq_up, s), jnp.float32), sq_up[:, :HW - s]],
                    axis=1)
            elif s < 0:
                shifted = jnp.concatenate(
                    [sq_up[:, -s:], jnp.zeros((Csq_up, -s), jnp.float32)],
                    axis=1)
            else:
                shifted = sq_up
            dx = kx - pad
            if dx < 0:
                shifted = jnp.where(col >= -dx, shifted, 0.0)
            elif dx > 0:
                shifted = jnp.where(col <= (W - 1) - dx, shifted, 0.0)
            taps.append(shifted)
    tap_mat = jnp.concatenate(taps, axis=0).astype(jnp.bfloat16)  # (ks*ks*Csq_up, HW)
    gwc = jnp.dot(w_gwc_ref[...], tap_mat,
                  preferred_element_type=jnp.float32) + b_gwc_ref[...]   # (C, HW)

    # Y1 = GWC(up) + PWC1(up)
    Y1 = gwc + jnp.dot(w_pwc1_ref[...], sq_up.astype(jnp.bfloat16),
                       preferred_element_type=jnp.float32)          # (C, HW)
    # Y2 = cat([PWC2(low), low]) -- never materialized.
    pwc2 = jnp.dot(w_pwc2_ref[...], sq_low.astype(jnp.bfloat16),
                   preferred_element_type=jnp.float32)              # (Cm, HW)

    # softmax over per-channel means of cat([Y1, Y2]) (2C values), then gate
    # and fold the halves: res = s1*Y1 + s2*Y2 (computed piecewise).
    m1 = jnp.sum(Y1, axis=1, keepdims=True) * inv_hw                # (C, 1)
    m2a = jnp.sum(pwc2, axis=1, keepdims=True) * inv_hw             # (Cm, 1)
    m2b = jnp.sum(sq_low, axis=1, keepdims=True) * inv_hw           # (Csq_low, 1)
    mx = jnp.maximum(jnp.max(m1, keepdims=True),
                     jnp.maximum(jnp.max(m2a, keepdims=True),
                                 jnp.max(m2b, keepdims=True)))      # (1, 1)
    e1 = jnp.exp(m1 - mx)
    e2a = jnp.exp(m2a - mx)
    e2b = jnp.exp(m2b - mx)
    denom = (jnp.sum(e1, axis=0, keepdims=True)
             + jnp.sum(e2a, axis=0, keepdims=True)
             + jnp.sum(e2b, axis=0, keepdims=True))                 # (1, 1)
    inv0 = pl.reciprocal(denom, approx=True)                        # EUP
    inv_d = inv0 * (2.0 - denom * inv0)                             # one Newton step
    s1 = e1 * inv_d                                                 # (C, 1)
    res_top = s1[:Cm, :] * Y1[:Cm, :] + (e2a * inv_d) * pwc2        # (Cm, HW)
    res_bot = s1[Cm:, :] * Y1[Cm:, :] + (e2b * inv_d) * sq_low      # (Csq_low, HW)
    out_ref[0] = jnp.concatenate([res_top, res_bot],
                                 axis=0).astype(out_ref.dtype)      # lane-dense store


# ----------------------------------------------------------------------------
# Wrapper
# ----------------------------------------------------------------------------
def scconv_forward(x_nchw, p):
    """x_nchw: (N, C, H, W) float32 -> (N, C, H, W) float32."""
    N, C, H, W = x_nchw.shape
    HW = H * W
    up_ch = p["up_ch"]
    low_ch = C - up_ch
    csq_up = p["w_s1"].shape[0]
    csq_low = p["w_s2"].shape[0]
    ks = p["group_kernel_size"]

    x2 = x_nchw.reshape(N, C, HW).astype(jnp.bfloat16)      # free reshape; bf16 HBM stream
    gmap = p["gmap"].astype(jnp.float32)
    gamma = p["gamma"].reshape(C, 1).astype(jnp.float32)
    beta = p["beta"].reshape(C, 1).astype(jnp.float32)
    b_gwc = p["b_gwc"].reshape(C, 1).astype(jnp.float32)
    w_s1 = p["w_s1"].astype(jnp.bfloat16)
    w_s2 = p["w_s2"].astype(jnp.bfloat16)
    w_gwc = p["w_gwc_fused"].astype(jnp.bfloat16)
    w_pwc1 = p["w_pwc1"].astype(jnp.bfloat16)
    w_pwc2 = p["w_pwc2"].astype(jnp.bfloat16)

    kernel = functools.partial(
        scconv_kernel, H=H, W=W, up_ch=up_ch, ks=ks,
        gate_threshold=float(p["gate_treshold"]), eps=float(p["eps"]))

    # Advisory cost estimate for the XLA scheduler.
    mm_flops = 2 * HW * (csq_up * up_ch + csq_low * low_ch
                         + C * ks * ks * csq_up + C * csq_up
                         + (C - csq_low) * csq_low + 2 * C * C)
    flops = int(N * (mm_flops + 40 * C * HW))
    transcendentals = int(N * (C * HW + 4 * C))
    bytes_accessed = int(x2.size * 2 + N * C * HW * 4
                         + sum(int(np.prod(a.shape)) * 2
                               for a in (w_s1, w_s2, w_gwc, w_pwc1, w_pwc2))
                         + (gmap.size + 3 * C) * 4)

    out = pl.pallas_call(
        kernel,
        out_shape=jax.ShapeDtypeStruct((N, C, HW), jnp.float32),
        grid_spec=pltpu.PrefetchScalarGridSpec(
            num_scalar_prefetch=0,
            grid=(N,),
            in_specs=[
                pl.BlockSpec((1, C, HW), lambda n: (n, 0, 0)),
                pl.BlockSpec(gmap.shape, lambda n: (0, 0)),
                pl.BlockSpec((C, 1), lambda n: (0, 0)),
                pl.BlockSpec((C, 1), lambda n: (0, 0)),
                pl.BlockSpec(w_s1.shape, lambda n: (0, 0)),
                pl.BlockSpec(w_s2.shape, lambda n: (0, 0)),
                pl.BlockSpec(w_gwc.shape, lambda n: (0, 0)),
                pl.BlockSpec((C, 1), lambda n: (0, 0)),
                pl.BlockSpec(w_pwc1.shape, lambda n: (0, 0)),
                pl.BlockSpec(w_pwc2.shape, lambda n: (0, 0)),
            ],
            out_specs=pl.BlockSpec((1, C, HW), lambda n: (n, 0, 0)),
        ),
        compiler_params=pltpu.CompilerParams(
            dimension_semantics=("parallel",)),   # batch images shard across TCs on v7x
        cost_estimate=pl.CostEstimate(
            flops=flops, transcendentals=transcendentals,
            bytes_accessed=bytes_accessed),
    )(x2, gmap, gamma, beta, w_s1, w_s2, w_gwc, b_gwc, w_pwc1, w_pwc2)

    return out.reshape(N, C, H, W)


# ----------------------------------------------------------------------------
# Parameter construction (mirrors the PyTorch __init__ shapes)
# ----------------------------------------------------------------------------
def make_params(key, op_channel, *, group_num=4, gate_treshold=0.5, alpha=0.5,
                squeeze_radio=2, group_size=2, group_kernel_size=3):
    C = op_channel
    up_ch = int(alpha * C)
    low_ch = C - up_ch
    csq_up = up_ch // squeeze_radio
    csq_low = low_ch // squeeze_radio
    ks = group_kernel_size
    in_pg = csq_up // group_size
    out_pg = C // group_size

    def _bf(a):  # bf16-representable values stored as f32 (MXU operands run in bf16)
        return a.astype(jnp.bfloat16).astype(jnp.float32)

    keys = jax.random.split(key, 8)
    scale = 0.25
    gamma = 1.0 + 0.2 * jax.random.normal(keys[0], (C,), jnp.float32)
    beta = 0.1 * jax.random.normal(keys[1], (C,), jnp.float32)
    w_s1 = _bf(scale * jax.random.normal(keys[2], (csq_up, up_ch), jnp.float32))
    w_s2 = _bf(scale * jax.random.normal(keys[3], (csq_low, low_ch), jnp.float32))
    w_pwc1 = _bf(scale * jax.random.normal(keys[4], (C, csq_up), jnp.float32))
    w_pwc2 = _bf(scale * jax.random.normal(keys[5], (C - csq_low, csq_low),
                                           jnp.float32))
    w_gwc_oihw = _bf(scale * jax.random.normal(keys[6], (C, in_pg, ks, ks),
                                               jnp.float32))
    b_gwc = 0.1 * jax.random.normal(keys[7], (C,), jnp.float32)

    # Fused im2col GWC weight: (C, ks*ks*csq_up); column (ky*ks+kx)*csq_up + cin
    # is the tap weight of global squeezed-input channel cin (block-diagonal
    # over the conv groups).
    wf = np.zeros((C, ks * ks * csq_up), np.float32)
    w_np = np.asarray(w_gwc_oihw)
    for ky in range(ks):
        for kx in range(ks):
            t = ky * ks + kx
            for g in range(group_size):
                blk = w_np[g * out_pg:(g + 1) * out_pg, :, ky, kx]
                wf[g * out_pg:(g + 1) * out_pg,
                   t * csq_up + g * in_pg:t * csq_up + (g + 1) * in_pg] = blk
    w_gwc_fused = jnp.asarray(wf)

    # Group-average matrix for GroupNorm stats: row i averages the channels of
    # channel i's group (the 1/HW factor is applied in-kernel).
    cg = C // group_num
    gmap = jnp.asarray(np.kron(np.eye(group_num, dtype=np.float32),
                               np.ones((cg, cg), np.float32)) / float(cg))

    return dict(up_ch=up_ch, group_num=group_num, group_size=group_size,
                group_kernel_size=ks, gate_treshold=gate_treshold, eps=1e-5,
                gamma=gamma, beta=beta, gmap=gmap,
                w_s1=w_s1, w_s2=w_s2, w_pwc1=w_pwc1, w_pwc2=w_pwc2,
                w_gwc_oihw=w_gwc_oihw, w_gwc_fused=w_gwc_fused, b_gwc=b_gwc)


# ----------------------------------------------------------------------------
# Pure-JAX NCHW reference mirroring the PyTorch SCConv forward.
# bf16 rounding is applied at the MXU operand boundaries to match the kernel's
# mixed-precision matmuls (accumulation stays f32).
# ----------------------------------------------------------------------------
def _round_bf16(a):
    return a.astype(jnp.bfloat16).astype(jnp.float32)


def scconv_ref(x, p):
    N, C, H, W = x.shape
    G = p["group_num"]
    gamma = p["gamma"]
    beta = p["beta"]
    ks = p["group_kernel_size"]
    pad = ks // 2

    # ---- SRU (nn.GroupNorm, torch_gn=True) ----
    xg = x.reshape(N, G, -1)
    mean = xg.mean(axis=2, keepdims=True)
    var = xg.var(axis=2, keepdims=True)
    gn = ((xg - mean) / jnp.sqrt(var + p["eps"])).reshape(N, C, H, W)
    gn = gn * gamma.reshape(1, C, 1, 1) + beta.reshape(1, C, 1, 1)
    w_gamma = (gamma / jnp.sum(gamma)).reshape(1, C, 1, 1)
    rw = jax.nn.sigmoid(gn * w_gamma)
    w1 = jnp.where(rw > p["gate_treshold"], 1.0, rw)
    w2 = jnp.where(rw > p["gate_treshold"], 0.0, rw)
    x1 = w1 * x
    x2 = w2 * x
    half = C // 2
    y = jnp.concatenate([x1[:, :half] + x2[:, half:],
                         x1[:, half:] + x2[:, :half]], axis=1)

    # ---- CRU ----
    Cu = p["up_ch"]
    up, low = y[:, :Cu], y[:, Cu:]
    up_b, low_b = _round_bf16(up), _round_bf16(low)
    sq_up = jnp.einsum("oc,nchw->nohw", p["w_s1"], up_b)
    sq_low = jnp.einsum("oc,nchw->nohw", p["w_s2"], low_b)
    sq_up_b, sq_low_b = _round_bf16(sq_up), _round_bf16(sq_low)
    gwc = lax.conv_general_dilated(
        sq_up_b, p["w_gwc_oihw"], window_strides=(1, 1),
        padding=((pad, pad), (pad, pad)),
        dimension_numbers=("NCHW", "OIHW", "NCHW"),
        feature_group_count=p["group_size"])
    gwc = gwc + p["b_gwc"].reshape(1, C, 1, 1)
    Y1 = gwc + jnp.einsum("oc,nchw->nohw", p["w_pwc1"], sq_up_b)
    Y2 = jnp.concatenate(
        [jnp.einsum("oc,nchw->nohw", p["w_pwc2"], sq_low_b), sq_low], axis=1)
    out = jnp.concatenate([Y1, Y2], axis=1)
    pooled = jnp.mean(out, axis=(2, 3), keepdims=True)
    s = jax.nn.softmax(pooled, axis=1)
    out = s * out
    return out[:, :C] + out[:, C:]


if __name__ == "__main__":
    N, C, H, W = 2, 8, 16, 16          # op_channel=8 -> up=4, low=4, squeeze->2
    key = jax.random.PRNGKey(0)
    kx_, kp_ = jax.random.split(key)
    x = jax.random.normal(kx_, (N, C, H, W), jnp.float32)
    x = x.astype(jnp.bfloat16).astype(jnp.float32)   # kernel streams x as bf16
    p = make_params(kp_, op_channel=C)

    out = jax.block_until_ready(scconv_forward(x, p))
    ref = jax.block_until_ready(scconv_ref(x, p))
    np.testing.assert_allclose(np.asarray(out), np.asarray(ref),
                               rtol=5e-3, atol=5e-4)
    assert out.shape == (N, C, H, W)
    print("KERNEL_OK")
</pallas_src>

<mosaic_0001>
module attributes {stable_mosaic.version = 11 : i64} {
  func.func @scconv_kernel(%arg0: i32, %arg1: memref<1x8x256xbf16, #tpu.memory_space<vmem>>, %arg2: memref<8x8xf32, #tpu.memory_space<vmem>>, %arg3: memref<8x1xf32, #tpu.memory_space<vmem>>, %arg4: memref<8x1xf32, #tpu.memory_space<vmem>>, %arg5: memref<2x4xbf16, #tpu.memory_space<vmem>>, %arg6: memref<2x4xbf16, #tpu.memory_space<vmem>>, %arg7: memref<8x18xbf16, #tpu.memory_space<vmem>>, %arg8: memref<8x1xf32, #tpu.memory_space<vmem>>, %arg9: memref<8x2xbf16, #tpu.memory_space<vmem>>, %arg10: memref<6x2xbf16, #tpu.memory_space<vmem>>, %arg11: memref<1x8x256xf32, #tpu.memory_space<vmem>>) attributes {dimension_semantics = [#tpu.dimension_semantics<parallel>], iteration_bounds = array<i64: 2>, scalar_prefetch = 0 : i64, scratch_operands = 0 : i64, tpu.core_type = #tpu.core_type<tc>, window_params = [{transform_indices = @transform_0, window_bounds = array<i64: 1, 8, 256>}, {pipeline_mode = #tpu.pipeline_mode<synchronous>, transform_indices = @transform_1, window_bounds = array<i64: 8, 8>}, {pipeline_mode = #tpu.pipeline_mode<synchronous>, transform_indices = @transform_2, window_bounds = array<i64: 8, 1>}, {pipeline_mode = #tpu.pipeline_mode<synchronous>, transform_indices = @transform_3, window_bounds = array<i64: 8, 1>}, {pipeline_mode = #tpu.pipeline_mode<synchronous>, transform_indices = @transform_4, window_bounds = array<i64: 2, 4>}, {pipeline_mode = #tpu.pipeline_mode<synchronous>, transform_indices = @transform_5, window_bounds = array<i64: 2, 4>}, {pipeline_mode = #tpu.pipeline_mode<synchronous>, transform_indices = @transform_6, window_bounds = array<i64: 8, 18>}, {pipeline_mode = #tpu.pipeline_mode<synchronous>, transform_indices = @transform_7, window_bounds = array<i64: 8, 1>}, {pipeline_mode = #tpu.pipeline_mode<synchronous>, transform_indices = @transform_8, window_bounds = array<i64: 8, 2>}, {pipeline_mode = #tpu.pipeline_mode<synchronous>, transform_indices = @transform_9, window_bounds = array<i64: 6, 2>}, {transform_indices = @transform_10, window_bounds = array<i64: 1, 8, 256>}]} {
    %c0 = arith.constant 0 : index
    %c0_0 = arith.constant 0 : index
    %c0_1 = arith.constant 0 : index
    %0 = vector.load %arg1[%c0, %c0_0, %c0_1] : memref<1x8x256xbf16, #tpu.memory_space<vmem>>, vector<1x8x256xbf16>
    %1 = vector.shape_cast %0 : vector<1x8x256xbf16> to vector<8x256xbf16>
    %2 = arith.extf %1 : vector<8x256xbf16> to vector<8x256xf32>
    %c0_2 = arith.constant 0 : index
    %c0_3 = arith.constant 0 : index
    %3 = vector.load %arg2[%c0_2, %c0_3] : memref<8x8xf32, #tpu.memory_space<vmem>>, vector<8x8xf32>
    %cst = arith.constant dense<0.000000e+00> : vector<8x256xf32>
    %4 = tpu.matmul %3, %2, %cst {dimension_numbers = #tpu.dot_dimension_numbers<[1], [0], [0], [1], [0, 0, 1, 1], [], []>} : vector<8x8xf32>, vector<8x256xf32>, vector<8x256xf32> -> vector<8x256xf32>
    %cst_4 = arith.constant dense<0.000000e+00> : vector<8xf32>
    %5 = vector.multi_reduction <add>, %4, %cst_4 [1] : vector<8x256xf32> to vector<8xf32>
    %6 = vector.shape_cast %5 : vector<8xf32> to vector<8x1xf32>
    %cst_5 = arith.constant 3.906250e-03 : f32
    %7 = vector.broadcast %cst_5 : f32 to vector<8x1xf32>
    %8 = arith.mulf %6, %7 : vector<8x1xf32>
    %9 = arith.mulf %2, %2 : vector<8x256xf32>
    %cst_6 = arith.constant dense<0.000000e+00> : vector<8x256xf32>
    %10 = tpu.matmul %3, %9, %cst_6 {dimension_numbers = #tpu.dot_dimension_numbers<[1], [0], [0], [1], [0, 0, 1, 1], [], []>} : vector<8x8xf32>, vector<8x256xf32>, vector<8x256xf32> -> vector<8x256xf32>
    %cst_7 = arith.constant dense<0.000000e+00> : vector<8xf32>
    %11 = vector.multi_reduction <add>, %10, %cst_7 [1] : vector<8x256xf32> to vector<8xf32>
    %12 = vector.shape_cast %11 : vector<8xf32> to vector<8x1xf32>
    %cst_8 = arith.constant 3.906250e-03 : f32
    %13 = vector.broadcast %cst_8 : f32 to vector<8x1xf32>
    %14 = arith.mulf %12, %13 : vector<8x1xf32>
    %15 = arith.mulf %8, %8 : vector<8x1xf32>
    %16 = arith.subf %14, %15 : vector<8x1xf32>
    %cst_9 = arith.constant 9.99999974E-6 : f32
    %17 = vector.broadcast %cst_9 : f32 to vector<8x1xf32>
    %18 = arith.addf %16, %17 : vector<8x1xf32>
    %19 = math.rsqrt %18 : vector<8x1xf32>
    %c0_10 = arith.constant 0 : index
    %c0_11 = arith.constant 0 : index
    %20 = vector.load %arg3[%c0_10, %c0_11] : memref<8x1xf32, #tpu.memory_space<vmem>>, vector<8x1xf32>
    %c0_12 = arith.constant 0 : index
    %c0_13 = arith.constant 0 : index
    %21 = vector.load %arg4[%c0_12, %c0_13] : memref<8x1xf32, #tpu.memory_space<vmem>>, vector<8x1xf32>
    %22 = vector.broadcast %8 : vector<8x1xf32> to vector<8x256xf32>
    %23 = arith.subf %2, %22 : vector<8x256xf32>
    %24 = vector.broadcast %19 : vector<8x1xf32> to vector<8x256xf32>
    %25 = arith.mulf %23, %24 : vector<8x256xf32>
    %26 = vector.broadcast %20 : vector<8x1xf32> to vector<8x256xf32>
    %27 = arith.mulf %25, %26 : vector<8x256xf32>
    %28 = vector.broadcast %21 : vector<8x1xf32> to vector<8x256xf32>
    %29 = arith.addf %27, %28 : vector<8x256xf32>
    %cst_14 = arith.constant dense<0.000000e+00> : vector<1xf32>
    %30 = vector.multi_reduction <add>, %20, %cst_14 [0] : vector<8x1xf32> to vector<1xf32>
    %31 = vector.shape_cast %30 : vector<1xf32> to vector<1x1xf32>
    %32 = vector.broadcast %31 : vector<1x1xf32> to vector<8x1xf32>
    %33 = arith.divf %20, %32 : vector<8x1xf32>
    %34 = vector.broadcast %33 : vector<8x1xf32> to vector<8x256xf32>
    %35 = arith.mulf %29, %34 : vector<8x256xf32>
    %cst_15 = arith.constant 0.000000e+00 : f32
    %36 = vector.broadcast %cst_15 : f32 to vector<8x256xf32>
    %37 = arith.subf %36, %35 : vector<8x256xf32>
    %38 = math.exp %37 : vector<8x256xf32>
    %cst_16 = arith.constant 1.000000e+00 : f32
    %39 = vector.broadcast %cst_16 : f32 to vector<8x256xf32>
    %40 = arith.addf %39, %38 : vector<8x256xf32>
    %cst_17 = arith.constant 1.000000e+00 : f32
    %41 = vector.broadcast %cst_17 : f32 to vector<8x256xf32>
    %42 = arith.divf %41, %40 : vector<8x256xf32>
    %cst_18 = arith.constant 5.000000e-01 : f32
    %43 = vector.broadcast %cst_18 : f32 to vector<8x256xf32>
    %44 = arith.cmpf ogt, %42, %43 : vector<8x256xf32>
    %cst_19 = arith.constant 1.000000e+00 : f32
    %45 = vector.broadcast %cst_19 : f32 to vector<8x256xf32>
    %46 = arith.select %44, %45, %42 : vector<8x256xi1>, vector<8x256xf32>
    %cst_20 = arith.constant 5.000000e-01 : f32
    %47 = vector.broadcast %cst_20 : f32 to vector<8x256xf32>
    %48 = arith.cmpf ogt, %42, %47 : vector<8x256xf32>
    %cst_21 = arith.constant 0.000000e+00 : f32
    %49 = vector.broadcast %cst_21 : f32 to vector<8x256xf32>
    %50 = arith.select %48, %49, %42 : vector<8x256xi1>, vector<8x256xf32>
    %51 = arith.mulf %46, %2 : vector<8x256xf32>
    %52 = arith.mulf %50, %2 : vector<8x256xf32>
    %53 = vector.extract_strided_slice %51 {offsets = [0, 0], sizes = [4, 256], strides = [1, 1]} : vector<8x256xf32> to vector<4x256xf32>
    %54 = vector.extract_strided_slice %52 {offsets = [4, 0], sizes = [4, 256], strides = [1, 1]} : vector<8x256xf32> to vector<4x256xf32>
    %55 = arith.addf %53, %54 : vector<4x256xf32>
    %56 = vector.extract_strided_slice %51 {offsets = [4, 0], sizes = [4, 256], strides = [1, 1]} : vector<8x256xf32> to vector<4x256xf32>
    %57 = vector.extract_strided_slice %52 {offsets = [0, 0], sizes = [4, 256], strides = [1, 1]} : vector<8x256xf32> to vector<4x256xf32>
    %58 = arith.addf %56, %57 : vector<4x256xf32>
    %c0_22 = arith.constant 0 : index
    %c0_23 = arith.constant 0 : index
    %59 = vector.load %arg5[%c0_22, %c0_23] : memref<2x4xbf16, #tpu.memory_space<vmem>>, vector<2x4xbf16>
    %60 = arith.truncf %55 : vector<4x256xf32> to vector<4x256xbf16>
    %cst_24 = arith.constant dense<0.000000e+00> : vector<2x256xf32>
    %61 = tpu.matmul %59, %60, %cst_24 {dimension_numbers = #tpu.dot_dimension_numbers<[1], [0], [0], [1], [0, 0, 1, 1], [], []>} : vector<2x4xbf16>, vector<4x256xbf16>, vector<2x256xf32> -> vector<2x256xf32>
    %c0_25 = arith.constant 0 : index
    %c0_26 = arith.constant 0 : index
    %62 = vector.load %arg6[%c0_25, %c0_26] : memref<2x4xbf16, #tpu.memory_space<vmem>>, vector<2x4xbf16>
    %63 = arith.truncf %58 : vector<4x256xf32> to vector<4x256xbf16>
    %cst_27 = arith.constant dense<0.000000e+00> : vector<2x256xf32>
    %64 = tpu.matmul %62, %63, %cst_27 {dimension_numbers = #tpu.dot_dimension_numbers<[1], [0], [0], [1], [0, 0, 1, 1], [], []>} : vector<2x4xbf16>, vector<4x256xbf16>, vector<2x256xf32> -> vector<2x256xf32>
    %65 = tpu.iota {dimensions = array<i32: 1>} : vector<1x256xi32>
    %c15_i32 = arith.constant 15 : i32
    %66 = vector.broadcast %c15_i32 : i32 to vector<1x256xi32>
    %67 = arith.andi %65, %66 : vector<1x256xi32>
    %cst_28 = arith.constant 0.000000e+00 : f32
    %68 = vector.broadcast %cst_28 : f32 to vector<2x17xf32>
    %69 = vector.extract_strided_slice %61 {offsets = [0, 0], sizes = [2, 239], strides = [1, 1]} : vector<2x256xf32> to vector<2x239xf32>
    %70 = tpu.concatenate %68, %69 in 1 : vector<2x17xf32>, vector<2x239xf32> -> vector<2x256xf32>
    %c1_i32 = arith.constant 1 : i32
    %71 = vector.broadcast %c1_i32 : i32 to vector<1x256xi32>
    %72 = arith.cmpi sge, %67, %71 : vector<1x256xi32>
    %cst_29 = arith.constant 0.000000e+00 : f32
    %73 = vector.shape_cast %72 : vector<1x256xi1> to vector<1x256xi1>
    %74 = vector.broadcast %73 : vector<1x256xi1> to vector<2x256xi1>
    %75 = vector.broadcast %cst_29 : f32 to vector<2x256xf32>
    %76 = arith.select %74, %70, %75 : vector<2x256xi1>, vector<2x256xf32>
    %cst_30 = arith.constant 0.000000e+00 : f32
    %77 = vector.broadcast %cst_30 : f32 to vector<2x16xf32>
    %78 = vector.extract_strided_slice %61 {offsets = [0, 0], sizes = [2, 240], strides = [1, 1]} : vector<2x256xf32> to vector<2x240xf32>
    %79 = tpu.concatenate %77, %78 in 1 : vector<2x16xf32>, vector<2x240xf32> -> vector<2x256xf32>
    %cst_31 = arith.constant 0.000000e+00 : f32
    %80 = vector.broadcast %cst_31 : f32 to vector<2x15xf32>
    %81 = vector.extract_strided_slice %61 {offsets = [0, 0], sizes = [2, 241], strides = [1, 1]} : vector<2x256xf32> to vector<2x241xf32>
    %82 = tpu.concatenate %80, %81 in 1 : vector<2x15xf32>, vector<2x241xf32> -> vector<2x256xf32>
    %c14_i32 = arith.constant 14 : i32
    %83 = vector.broadcast %c14_i32 : i32 to vector<1x256xi32>
    %84 = arith.cmpi sle, %67, %83 : vector<1x256xi32>
    %cst_32 = arith.constant 0.000000e+00 : f32
    %85 = vector.shape_cast %84 : vector<1x256xi1> to vector<1x256xi1>
    %86 = vector.broadcast %85 : vector<1x256xi1> to vector<2x256xi1>
    %87 = vector.broadcast %cst_32 : f32 to vector<2x256xf32>
    %88 = arith.select %86, %82, %87 : vector<2x256xi1>, vector<2x256xf32>
    %cst_33 = arith.constant 0.000000e+00 : f32
    %89 = vector.broadcast %cst_33 : f32 to vector<2x1xf32>
    %90 = vector.extract_strided_slice %61 {offsets = [0, 0], sizes = [2, 255], strides = [1, 1]} : vector<2x256xf32> to vector<2x255xf32>
    %91 = tpu.concatenate %89, %90 in 1 : vector<2x1xf32>, vector<2x255xf32> -> vector<2x256xf32>
    %c1_i32_34 = arith.constant 1 : i32
    %92 = vector.broadcast %c1_i32_34 : i32 to vector<1x256xi32>
    %93 = arith.cmpi sge, %67, %92 : vector<1x256xi32>
    %cst_35 = arith.constant 0.000000e+00 : f32
    %94 = vector.shape_cast %93 : vector<1x256xi1> to vector<1x256xi1>
    %95 = vector.broadcast %94 : vector<1x256xi1> to vector<2x256xi1>
    %96 = vector.broadcast %cst_35 : f32 to vector<2x256xf32>
    %97 = arith.select %95, %91, %96 : vector<2x256xi1>, vector<2x256xf32>
    %98 = vector.extract_strided_slice %61 {offsets = [0, 1], sizes = [2, 255], strides = [1, 1]} : vector<2x256xf32> to vector<2x255xf32>
    %cst_36 = arith.constant 0.000000e+00 : f32
    %99 = vector.broadcast %cst_36 : f32 to vector<2x1xf32>
    %100 = tpu.concatenate %98, %99 in 1 : vector<2x255xf32>, vector<2x1xf32> -> vector<2x256xf32>
    %c14_i32_37 = arith.constant 14 : i32
    %101 = vector.broadcast %c14_i32_37 : i32 to vector<1x256xi32>
    %102 = arith.cmpi sle, %67, %101 : vector<1x256xi32>
    %cst_38 = arith.constant 0.000000e+00 : f32
    %103 = vector.shape_cast %102 : vector<1x256xi1> to vector<1x256xi1>
    %104 = vector.broadcast %103 : vector<1x256xi1> to vector<2x256xi1>
    %105 = vector.broadcast %cst_38 : f32 to vector<2x256xf32>
    %106 = arith.select %104, %100, %105 : vector<2x256xi1>, vector<2x256xf32>
    %107 = vector.extract_strided_slice %61 {offsets = [0, 15], sizes = [2, 241], strides = [1, 1]} : vector<2x256xf32> to vector<2x241xf32>
    %cst_39 = arith.constant 0.000000e+00 : f32
    %108 = vector.broadcast %cst_39 : f32 to vector<2x15xf32>
    %109 = tpu.concatenate %107, %108 in 1 : vector<2x241xf32>, vector<2x15xf32> -> vector<2x256xf32>
    %c1_i32_40 = arith.constant 1 : i32
    %110 = vector.broadcast %c1_i32_40 : i32 to vector<1x256xi32>
    %111 = arith.cmpi sge, %67, %110 : vector<1x256xi32>
    %cst_41 = arith.constant 0.000000e+00 : f32
    %112 = vector.shape_cast %111 : vector<1x256xi1> to vector<1x256xi1>
    %113 = vector.broadcast %112 : vector<1x256xi1> to vector<2x256xi1>
    %114 = vector.broadcast %cst_41 : f32 to vector<2x256xf32>
    %115 = arith.select %113, %109, %114 : vector<2x256xi1>, vector<2x256xf32>
    %116 = vector.extract_strided_slice %61 {offsets = [0, 16], sizes = [2, 240], strides = [1, 1]} : vector<2x256xf32> to vector<2x240xf32>
    %cst_42 = arith.constant 0.000000e+00 : f32
    %117 = vector.broadcast %cst_42 : f32 to vector<2x16xf32>
    %118 = tpu.concatenate %116, %117 in 1 : vector<2x240xf32>, vector<2x16xf32> -> vector<2x256xf32>
    %119 = vector.extract_strided_slice %61 {offsets = [0, 17], sizes = [2, 239], strides = [1, 1]} : vector<2x256xf32> to vector<2x239xf32>
    %cst_43 = arith.constant 0.000000e+00 : f32
    %120 = vector.broadcast %cst_43 : f32 to vector<2x17xf32>
    %121 = tpu.concatenate %119, %120 in 1 : vector<2x239xf32>, vector<2x17xf32> -> vector<2x256xf32>
    %c14_i32_44 = arith.constant 14 : i32
    %122 = vector.broadcast %c14_i32_44 : i32 to vector<1x256xi32>
    %123 = arith.cmpi sle, %67, %122 : vector<1x256xi32>
    %cst_45 = arith.constant 0.000000e+00 : f32
    %124 = vector.shape_cast %123 : vector<1x256xi1> to vector<1x256xi1>
    %125 = vector.broadcast %124 : vector<1x256xi1> to vector<2x256xi1>
    %126 = vector.broadcast %cst_45 : f32 to vector<2x256xf32>
    %127 = arith.select %125, %121, %126 : vector<2x256xi1>, vector<2x256xf32>
    %128 = tpu.concatenate %76, %79, %88, %97, %61, %106, %115, %118, %127 in 0 : vector<2x256xf32>, vector<2x256xf32>, vector<2x256xf32>, vector<2x256xf32>, vector<2x256xf32>, vector<2x256xf32>, vector<2x256xf32>, vector<2x256xf32>, vector<2x256xf32> -> vector<18x256xf32>
    %129 = arith.truncf %128 : vector<18x256xf32> to vector<18x256xbf16>
    %c0_46 = arith.constant 0 : index
    %c0_47 = arith.constant 0 : index
    %130 = vector.load %arg7[%c0_46, %c0_47] : memref<8x18xbf16, #tpu.memory_space<vmem>>, vector<8x18xbf16>
    %cst_48 = arith.constant dense<0.000000e+00> : vector<8x256xf32>
    %131 = tpu.matmul %130, %129, %cst_48 {dimension_numbers = #tpu.dot_dimension_numbers<[1], [0], [0], [1], [0, 0, 1, 1], [], []>} : vector<8x18xbf16>, vector<18x256xbf16>, vector<8x256xf32> -> vector<8x256xf32>
    %c0_49 = arith.constant 0 : index
    %c0_50 = arith.constant 0 : index
    %132 = vector.load %arg8[%c0_49, %c0_50] : memref<8x1xf32, #tpu.memory_space<vmem>>, vector<8x1xf32>
    %133 = vector.broadcast %132 : vector<8x1xf32> to vector<8x256xf32>
    %134 = arith.addf %131, %133 : vector<8x256xf32>
    %c0_51 = arith.constant 0 : index
    %c0_52 = arith.constant 0 : index
    %135 = vector.load %arg9[%c0_51, %c0_52] : memref<8x2xbf16, #tpu.memory_space<vmem>>, vector<8x2xbf16>
    %136 = arith.truncf %61 : vector<2x256xf32> to vector<2x256xbf16>
    %cst_53 = arith.constant dense<0.000000e+00> : vector<8x256xf32>
    %137 = tpu.matmul %135, %136, %cst_53 {dimension_numbers = #tpu.dot_dimension_numbers<[1], [0], [0], [1], [0, 0, 1, 1], [], []>} : vector<8x2xbf16>, vector<2x256xbf16>, vector<8x256xf32> -> vector<8x256xf32>
    %138 = arith.addf %134, %137 : vector<8x256xf32>
    %c0_54 = arith.constant 0 : index
    %c0_55 = arith.constant 0 : index
    %139 = vector.load %arg10[%c0_54, %c0_55] : memref<6x2xbf16, #tpu.memory_space<vmem>>, vector<6x2xbf16>
    %140 = arith.truncf %64 : vector<2x256xf32> to vector<2x256xbf16>
    %cst_56 = arith.constant dense<0.000000e+00> : vector<6x256xf32>
    %141 = tpu.matmul %139, %140, %cst_56 {dimension_numbers = #tpu.dot_dimension_numbers<[1], [0], [0], [1], [0, 0, 1, 1], [], []>} : vector<6x2xbf16>, vector<2x256xbf16>, vector<6x256xf32> -> vector<6x256xf32>
    %cst_57 = arith.constant dense<0.000000e+00> : vector<8xf32>
    %142 = vector.multi_reduction <add>, %138, %cst_57 [1] : vector<8x256xf32> to vector<8xf32>
    %143 = vector.shape_cast %142 : vector<8xf32> to vector<8x1xf32>
    %cst_58 = arith.constant 3.906250e-03 : f32
    %144 = vector.broadcast %cst_58 : f32 to vector<8x1xf32>
    %145 = arith.mulf %143, %144 : vector<8x1xf32>
    %cst_59 = arith.constant dense<0.000000e+00> : vector<6xf32>
    %146 = vector.multi_reduction <add>, %141, %cst_59 [1] : vector<6x256xf32> to vector<6xf32>
    %147 = vector.shape_cast %146 : vector<6xf32> to vector<6x1xf32>
    %cst_60 = arith.constant 3.906250e-03 : f32
    %148 = vector.broadcast %cst_60 : f32 to vector<6x1xf32>
    %149 = arith.mulf %147, %148 : vector<6x1xf32>
    %cst_61 = arith.constant dense<0.000000e+00> : vector<2xf32>
    %150 = vector.multi_reduction <add>, %64, %cst_61 [1] : vector<2x256xf32> to vector<2xf32>
    %151 = vector.shape_cast %150 : vector<2xf32> to vector<2x1xf32>
    %cst_62 = arith.constant 3.906250e-03 : f32
    %152 = vector.broadcast %cst_62 : f32 to vector<2x1xf32>
    %153 = arith.mulf %151, %152 : vector<2x1xf32>
    %154 = vector.shape_cast %145 : vector<8x1xf32> to vector<1x8x1xf32>
    %cst_63 = arith.constant dense<0xFF800000> : vector<1xf32>
    %155 = vector.multi_reduction <maximumf>, %154, %cst_63 [1, 2] : vector<1x8x1xf32> to vector<1xf32>
    %156 = vector.shape_cast %155 : vector<1xf32> to vector<1x1x1xf32>
    %157 = vector.extract %156[0, 0, 0] : f32 from vector<1x1x1xf32>
    %158 = vector.broadcast %157 : f32 to vector<1x1xf32>
    %159 = vector.shape_cast %149 : vector<6x1xf32> to vector<1x6x1xf32>
    %cst_64 = arith.constant dense<0xFF800000> : vector<1xf32>
    %160 = vector.multi_reduction <maximumf>, %159, %cst_64 [1, 2] : vector<1x6x1xf32> to vector<1xf32>
    %161 = vector.shape_cast %160 : vector<1xf32> to vector<1x1x1xf32>
    %162 = vector.extract %161[0, 0, 0] : f32 from vector<1x1x1xf32>
    %163 = vector.broadcast %162 : f32 to vector<1x1xf32>
    %164 = vector.shape_cast %153 : vector<2x1xf32> to vector<1x2x1xf32>
    %cst_65 = arith.constant dense<0xFF800000> : vector<1xf32>
    %165 = vector.multi_reduction <maximumf>, %164, %cst_65 [1, 2] : vector<1x2x1xf32> to vector<1xf32>
    %166 = vector.shape_cast %165 : vector<1xf32> to vector<1x1x1xf32>
    %167 = vector.extract %166[0, 0, 0] : f32 from vector<1x1x1xf32>
    %168 = vector.broadcast %167 : f32 to vector<1x1xf32>
    %169 = arith.maximumf %163, %168 : vector<1x1xf32>
    %170 = arith.maximumf %158, %169 : vector<1x1xf32>
    %171 = vector.broadcast %170 : vector<1x1xf32> to vector<8x1xf32>
    %172 = arith.subf %145, %171 : vector<8x1xf32>
    %173 = math.exp %172 : vector<8x1xf32>
    %174 = vector.broadcast %170 : vector<1x1xf32> to vector<6x1xf32>
    %175 = arith.subf %149, %174 : vector<6x1xf32>
    %176 = math.exp %175 : vector<6x1xf32>
    %177 = vector.broadcast %170 : vector<1x1xf32> to vector<2x1xf32>
    %178 = arith.subf %153, %177 : vector<2x1xf32>
    %179 = math.exp %178 : vector<2x1xf32>
    %cst_66 = arith.constant dense<0.000000e+00> : vector<1xf32>
    %180 = vector.multi_reduction <add>, %173, %cst_66 [0] : vector<8x1xf32> to vector<1xf32>
    %181 = vector.shape_cast %180 : vector<1xf32> to vector<1x1xf32>
    %cst_67 = arith.constant dense<0.000000e+00> : vector<1xf32>
    %182 = vector.multi_reduction <add>, %176, %cst_67 [0] : vector<6x1xf32> to vector<1xf32>
    %183 = vector.shape_cast %182 : vector<1xf32> to vector<1x1xf32>
    %184 = arith.addf %181, %183 : vector<1x1xf32>
    %cst_68 = arith.constant dense<0.000000e+00> : vector<1xf32>
    %185 = vector.multi_reduction <add>, %179, %cst_68 [0] : vector<2x1xf32> to vector<1xf32>
    %186 = vector.shape_cast %185 : vector<1xf32> to vector<1x1xf32>
    %187 = arith.addf %184, %186 : vector<1x1xf32>
    %188 = tpu.reciprocal %187 {approx = true} : vector<1x1xf32> -> vector<1x1xf32>
    %189 = arith.mulf %187, %188 : vector<1x1xf32>
    %cst_69 = arith.constant 2.000000e+00 : f32
    %190 = vector.broadcast %cst_69 : f32 to vector<1x1xf32>
    %191 = arith.subf %190, %189 : vector<1x1xf32>
    %192 = arith.mulf %188, %191 : vector<1x1xf32>
    %193 = vector.broadcast %192 : vector<1x1xf32> to vector<8x1xf32>
    %194 = arith.mulf %173, %193 : vector<8x1xf32>
    %195 = vector.extract_strided_slice %194 {offsets = [0, 0], sizes = [6, 1], strides = [1, 1]} : vector<8x1xf32> to vector<6x1xf32>
    %196 = vector.extract_strided_slice %138 {offsets = [0, 0], sizes = [6, 256], strides = [1, 1]} : vector<8x256xf32> to vector<6x256xf32>
    %197 = vector.broadcast %195 : vector<6x1xf32> to vector<6x256xf32>
    %198 = arith.mulf %197, %196 : vector<6x256xf32>
    %199 = vector.broadcast %192 : vector<1x1xf32> to vector<6x1xf32>
    %200 = arith.mulf %176, %199 : vector<6x1xf32>
    %201 = vector.broadcast %200 : vector<6x1xf32> to vector<6x256xf32>
    %202 = arith.mulf %201, %141 : vector<6x256xf32>
    %203 = arith.addf %198, %202 : vector<6x256xf32>
    %204 = vector.extract_strided_slice %194 {offsets = [6, 0], sizes = [2, 1], strides = [1, 1]} : vector<8x1xf32> to vector<2x1xf32>
    %205 = vector.extract_strided_slice %138 {offsets = [6, 0], sizes = [2, 256], strides = [1, 1]} : vector<8x256xf32> to vector<2x256xf32>
    %206 = vector.broadcast %204 : vector<2x1xf32> to vector<2x256xf32>
    %207 = arith.mulf %206, %205 : vector<2x256xf32>
    %208 = vector.broadcast %192 : vector<1x1xf32> to vector<2x1xf32>
    %209 = arith.mulf %179, %208 : vector<2x1xf32>
    %210 = vector.broadcast %209 : vector<2x1xf32> to vector<2x256xf32>
    %211 = arith.mulf %210, %64 : vector<2x256xf32>
    %212 = arith.addf %207, %211 : vector<2x256xf32>
    %213 = tpu.concatenate %203, %212 in 0 : vector<6x256xf32>, vector<2x256xf32> -> vector<8x256xf32>
    %c0_70 = arith.constant 0 : index
    %c0_71 = arith.constant 0 : index
    %c0_72 = arith.constant 0 : index
    %214 = vector.load %arg11[%c0_70, %c0_71, %c0_72] : memref<1x8x256xf32, #tpu.memory_space<vmem>>, vector<1x8x256xf32>
    %215 = vector.shape_cast %214 : vector<1x8x256xf32> to vector<8x256xf32>
    %216 = vector.shape_cast %213 : vector<8x256xf32> to vector<1x8x256xf32>
    tpu.vector_store %arg11[%c0_70, %c0_71, %c0_72], %216 {strides = array<i32>} : memref<1x8x256xf32, #tpu.memory_space<vmem>>, vector<1x8x256xf32>,
    return
  }
  func.func @transform_0(%arg0: i32) -> (i32, i32, i32) {
    %c0_i32 = arith.constant 0 : i32
    %c0_i32_0 = arith.constant 0 : i32
    %c0_i32_1 = arith.constant 0 : i32
    return %arg0, %c0_i32, %c0_i32_0 : i32, i32, i32
  }
  func.func @transform_1(%arg0: i32) -> (i32, i32) {
    %c0_i32 = arith.constant 0 : i32
    %c0_i32_0 = arith.constant 0 : i32
    %c0_i32_1 = arith.constant 0 : i32
    return %c0_i32, %c0_i32_0 : i32, i32
  }
  func.func @transform_2(%arg0: i32) -> (i32, i32) {
    %c0_i32 = arith.constant 0 : i32
    %c0_i32_0 = arith.constant 0 : i32
    %c0_i32_1 = arith.constant 0 : i32
    return %c0_i32, %c0_i32_0 : i32, i32
  }
  func.func @transform_3(%arg0: i32) -> (i32, i32) {
    %c0_i32 = arith.constant 0 : i32
    %c0_i32_0 = arith.constant 0 : i32
    %c0_i32_1 = arith.constant 0 : i32
    return %c0_i32, %c0_i32_0 : i32, i32
  }
  func.func @transform_4(%arg0: i32) -> (i32, i32) {
    %c0_i32 = arith.constant 0 : i32
    %c0_i32_0 = arith.constant 0 : i32
    %c0_i32_1 = arith.constant 0 : i32
    return %c0_i32, %c0_i32_0 : i32, i32
  }
  func.func @transform_5(%arg0: i32) -> (i32, i32) {
    %c0_i32 = arith.constant 0 : i32
    %c0_i32_0 = arith.constant 0 : i32
    %c0_i32_1 = arith.constant 0 : i32
    return %c0_i32, %c0_i32_0 : i32, i32
  }
  func.func @transform_6(%arg0: i32) -> (i32, i32) {
    %c0_i32 = arith.constant 0 : i32
    %c0_i32_0 = arith.constant 0 : i32
    %c0_i32_1 = arith.constant 0 : i32
    return %c0_i32, %c0_i32_0 : i32, i32
  }
  func.func @transform_7(%arg0: i32) -> (i32, i32) {
    %c0_i32 = arith.constant 0 : i32
    %c0_i32_0 = arith.constant 0 : i32
    %c0_i32_1 = arith.constant 0 : i32
    return %c0_i32, %c0_i32_0 : i32, i32
  }
  func.func @transform_8(%arg0: i32) -> (i32, i32) {
    %c0_i32 = arith.constant 0 : i32
    %c0_i32_0 = arith.constant 0 : i32
    %c0_i32_1 = arith.constant 0 : i32
    return %c0_i32, %c0_i32_0 : i32, i32
  }
  func.func @transform_9(%arg0: i32) -> (i32, i32) {
    %c0_i32 = arith.constant 0 : i32
    %c0_i32_0 = arith.constant 0 : i32
    %c0_i32_1 = arith.constant 0 : i32
    return %c0_i32, %c0_i32_0 : i32, i32
  }
  func.func @transform_10(%arg0: i32) -> (i32, i32, i32) {
    %c0_i32 = arith.constant 0 : i32
    %c0_i32_0 = arith.constant 0 : i32
    %c0_i32_1 = arith.constant 0 : i32
    return %arg0, %c0_i32, %c0_i32_0 : i32, i32, i32
  }
}

</mosaic_0001>

<bundles_post_ra>
// kernel: tpu_custom_call.1
= control target key start
LH: loop header
LB: loop body
LE: loop exit
PB: predicated region body
PF: predicated region fallthrough
CT: control target
= control target key end

     0   :  { %15 = vsyncpa [#allocation3], 0  ;;  %s1641_s0 = inlined_call_operand.vmem [shape: bf16[2,8,256], index: 0, kind: input, shape index: {}]   ;;  %s1642_s1 = inlined_call_operand.vmem [shape: f32[8,8], index: 1, kind: input, shape index: {}]   ;;  %s1643_s2 = inlined_call_operand.vmem [shape: f32[8,1], index: 2, kind: input, shape index: {}]   ;;  %s1644_s3 = inlined_call_operand.vmem [shape: f32[8,1], index: 3, kind: input, shape index: {}]   ;;  %s1645_s4 = inlined_call_operand.vmem [shape: bf16[2,4], index: 4, kind: input, shape index: {}]   ;;  %s1646_s5 = inlined_call_operand.vmem [shape: bf16[2,4], index: 5, kind: input, shape index: {}]   ;;  %s1647_s6 = inlined_call_operand.vmem [shape: bf16[8,18], index: 6, kind: input, shape index: {}]   ;;  %s1648_s7 = inlined_call_operand.vmem [shape: f32[8,1], index: 7, kind: input, shape index: {}]   ;;  %s1649_s8 = inlined_call_operand.vmem [shape: bf16[8,2], index: 8, kind: input, shape index: {}]   ;;  %s1650_s9 = inlined_call_operand.vmem [shape: bf16[6,2], index: 9, kind: input, shape index: {}]   ;;  %s1651_s10 = inlined_call_operand.hbm [shape: f32[2,8,256], index: 10, kind: output, shape index: {}]  }
   0x1   :  { %17 = vsyncpa [#allocation3 + $0x1], 0  ;;  %s1382_s13 = smov 0   ;;  %s1384_s14 = smov 0  }
   0x2   :  { %s1386_s15 = smov 0   ;;  %s1388_s16 = smov 0  }
   0x3 LB: > { %s1403_s17 = sadd.s32 4294967295, %s1316_s16   ;;  %s1109_s18 = sadd.s32 4294967294, %s1316_s16   ;;  %s1316_s16 = sphi %s1388_s16, %s1665_s16   ;;  %s1312_s15 = sphi %s1386_s15, %s1664_s15   ;;  %s1308_s14 = sphi %s1384_s14, %s1663_s14   ;;  %s1304_s13 = sphi %s1382_s13, %s1662_s13  }
   0x4   : > { %s1407_s19 = sadd.s32 1, %s1316_s16   ;;  %s245_s20 = sadd.s32 1, %s1312_s15 }
   0x5   : > { %s242_s21 = ssub.s32 %s1316_s16, %s1407_s19  ;;  %p255_p0 = scmp.ne.s32.totalorder %s1312_s15, %s1308_s14 }
   0x6   : > { %p243_p1 = scmp.eq.s32.totalorder %s242_s21, 0  ;;  %p256_p2 = scmp.eq.s32.totalorder %s1403_s17, 1 }
   0x7   : > { %p261_p3 = scmp.ne.s32.totalorder %s1308_s14, %s1304_s13  ;;  %p262_p4 = scmp.eq.s32.totalorder %s1109_s18, 1 }
   0x8   : > { %s1418_s22 = scalar_select %p243_p1, %s1312_s15, %s245_s20  }
   0x9   : > { %p1420_p5 = por %p256_p2, %p255_p0  ;;  %p1424_p6 = por %p262_p4, %p261_p3 }
   0xa   : > { %p1112_p7 = scmp.ge.s32.totalorder %s1316_s16, 1  ;;  %p315_p8 = scmp.lt.s32.totalorder %s1316_s16, 3 }
   0xc   : > { %p316_p9 = pnand %p1112_p7, %p315_p8 }
   0xd   : > { %p353_p10 = scmp.lt.s32.totalorder (!%p316_p9), %s1403_s17, 1  ;;  %s1320_s30 = smov (!%p316_p9), 111  }
   0xe   : > { %319 = sbr.rel (%p316_p9) target bundleno = 1021 (0x3fd), region = 60  ;;  %s1321_s11 = smov (!%p316_p9), 127  }
   0xf   : > { %s1322_s12 = smov (!%p316_p9), 113   ;;  %s1323_s18 = smov (!%p316_p9), 15  }
  0x10   : > { %s1324_s20 = smov (!%p316_p9), 1   ;;  %s1325_s21 = smov (!%p316_p9), 17  }
  0x11   : > { %s1136_s28 = sshll.u32 (!%p316_p9), %s1403_s17, 4 }
  0x13   : > { %s354_s25 = scalar_select %p353_p10, %s1403_s17, 1  ;;  %v362_v3 = vld [vmem:[%s1642_s1] sm:$0xff]  ;;  %vm363_vm0 = vcmask 64512   ;;  %vm490_vm1 = vcmask 7168   ;;  %v1318_v7 = vmov 0  }
  0x14   : > { %v470_v6 = vld [vmem:[%s1643_s2] sm:$0xff]  ;;  %1191 = vset.pattern.permute.xlu1 %v1318_v7  ;;  %1192 = vset.pattern.permute.xlu2 %v1318_v7 }
  0x15   : > { %s1135_s26 = sshll.u32 %s354_s25, 3  ;;  %v491_v8 = vsel %vm490_vm1, %v470_v6, 0.0  ;;  %478 = vperm.xlu1 %1191, %v470_v6   ;;  %1233 = vset.pattern.permute.xlu0 %v1318_v7  ;;  %v471_v12 = vld [vmem:[%s1644_s3] sm:$0xff]  ;;  %s1326_s25 = smov 112  }
  0x16   : > { %s357_s29 = scalar_lea.vmem %s1641_s0, %s1135_s26  ;;  %v492_v9 = vrot.slane %v491_v8, 4  ;;  %s350_s26 = sand.u32 1, %s1308_s14  }
  0x17   : > { %v359_v0 = vld [vmem:[%s357_s29] sm:$0xff]  ;;  %s1319_s29 = smov 16   ;;  %s1113_s27 = sshll.u32 %s350_s26, 4 }
  0x18   : > { %v1435_v1 = vunpack.c.l.bf16 %v359_v0  ;;  %v1437_v2 = vunpack.c.h.bf16 %v359_v0  ;;  %v493_v10 = vadd.f32 %v492_v9, %v491_v8 }
  0x1a   : > { %382 = vmatpush.msra.mxu2 %v1435_v1  ;;  %402 = vmatpush.msra.mxu3 %v1437_v2  ;;  %v411_v4 = vmul.f32 %v1435_v1, %v1435_v1  ;;  %v412_v5 = vmul.f32 %v1437_v2, %v1437_v2  ;;  %v494_v11 = vrot.slane %v493_v10, 2 }
  0x1b   : > { %1116 = vmatmul.msk.f32.vlgmr.msra.gmra.mxu2 %vm363_vm0, %v362_v3  ;;  %1117 = vmatmul.msk.f32.vlgmr.msra.gmra.mxu3 %vm363_vm0, %v362_v3 }
  0x1c   : > { %428 = vmatpush.msrb.mxu2 %v411_v4  ;;  %448 = vmatpush.msrb.mxu3 %v412_v5  ;;  %v495_v13 = vadd.f32 %v494_v11, %v493_v10 }
  0x1d   : > { %485 = vperm.xlu1 %1191, %v471_v12  }
  0x1e   : > { %v496_v14 = vrot.slane %v495_v13, 1 }
  0x20   : > { %v497_v15 = vadd.f32 %v496_v14, %v495_v13 }
  0x22   : > { %1234 = vrcp.f32 %v497_v15  ;;  %v509_v21 = vand.u32 2147483648, %v497_v15  ;;  %vm503_vm2 = vweird.f32 %v497_v15  ;;  %v507_v23 = vand.u32 2147483647, %v497_v15 }
  0x23   : > { %1118 = vmatmul.msk.f32.vlgmr.msrb.gmra.mxu2 %vm363_vm0, %v362_v3  ;;  %1119 = vmatmul.msk.f32.vlgmr.msrb.gmra.mxu3 %vm363_vm0, %v362_v3 }
  0x24   : > { %v510_v25 = vor.u32 1.1754944e-38, %v509_v21  ;;  %vm508_vm5 = vcmp.eq.f32.partialorder %v507_v23, 8.507059e+37 }
  0x28   : > { %v1235_v16 = vpop.eup %1234 }
  0x29   : > { %v499_v19 = vmul.f32 %v1235_v16, %v497_v15  ;;  %vm504_vm3 = vweird.f32 %v1235_v16 }
  0x2a   : > { %vm505_vm4 = vmor %vm503_vm2, %vm504_vm3 }
  0x2b   : > { %v500_v22 = vsub.f32 1.0, %v499_v19 }
  0x2d   : > { %v501_v24 = vmul.f32 %v1235_v16, %v500_v22 }
  0x2f   : > { %v502_v26 = vadd.f32 %v1235_v16, %v501_v24 }
  0x31   : > { %v506_v29 = vsel %vm505_vm4, %v1235_v16, %v502_v26  ;;  %vm583_vm4 = vcmask 1041408  }
  0x32   : > { %v511_v31 = vsel %vm508_vm5, %v510_v25, %v506_v29  ;;  %vm579_vm5 = vcmask 31744  }
  0x33   : > { %v512_v32 = vmul.f32 %v511_v31, %v470_v6 }
  0x35   : > { %515 = vperm.xlu2 %1192, %v512_v32  }
  0x87   : > { %v479_v44 = vpop.permute.xlu1 %478 }
  0x8f   : > { %v486_v54 = vpop.permute.xlu1 %485  ;;  %v516_v55 = vpop.permute.xlu2 %515 }
  0x9e   : > { %v384_v17 = vpop.f32.mrf.mxu2  ;;  %v404_v18 = vpop.f32.mrf.mxu3 }
  0x9f   : > { %v407_v20 = vadd.f32 %v404_v18, %v384_v17 }
  0xa1   : > { %408 = vadd.xlane.f32.xlu0 %v407_v20 }
  0xa6   : > { %v430_v27 = vpop.f32.mrf.mxu2  ;;  %v450_v28 = vpop.f32.mrf.mxu3 }
  0xa7   : > { %v453_v30 = vadd.f32 %v450_v28, %v430_v27 }
  0xa9   : > { %454 = vadd.xlane.f32.xlu0 %v453_v30 }
 0x114   : > { %v409_v33 = vpop.xlane.xlu0 %408 }
 0x115   : > { %v410_v34 = vmul.f32 0.00390625, %v409_v33 }
 0x117   : > { %v457_v36 = vmul.f32 %v410_v34, %v410_v34  ;;  %v472_v47 = vsub.f32 %v1435_v1, %v410_v34  ;;  %v473_v48 = vsub.f32 %v1437_v2, %v410_v34 }
 0x11c   : > { %v455_v35 = vpop.xlane.xlu0 %454 }
 0x11d   : > { %v456_v37 = vmul.f32 0.00390625, %v455_v35 }
 0x11f   : > { %v458_v38 = vsub.f32 %v456_v37, %v457_v36 }
 0x121   : > { %v459_v39 = vadd.f32 1e-05, %v458_v38 }
 0x123   : > { %1236 = vrsqrt.f32 %v459_v39  ;;  %vm466_vm7 = vweird.f32 %v459_v39 }
 0x129   : > { %v1237_v40 = vpop.eup %1236 }
 0x12a   : > { %v461_v41 = vmul.f32 %v1237_v40, %v459_v39  ;;  %vm467_vm6 = vweird.f32 %v1237_v40 }
 0x12b   : > { %vm468_vm8 = vmor %vm466_vm7, %vm467_vm6  ;;  %vm819_vm6 = vcmask 1040384   ;;  %vm855_vm7 = vcmask 15360  }
 0x12c   : > { %v462_v42 = vmul.f32 %v1237_v40, %v461_v41 }
 0x12e   : > { %v463_v43 = vmul.f32 0.5, %v462_v42 }
 0x130   : > { %v464_v45 = vsub.f32 1.5, %v463_v43 }
 0x132   : > { %v465_v46 = vmul.f32 %v1237_v40, %v464_v45  ;;  %v616_v45 = vld [vmem:[%s1646_s5] sm:$0x1] }
 0x134   : > { %v469_v49 = vsel %vm468_vm8, %v1237_v40, %v465_v46  ;;  %vm719_vm8 = vcmask 1039360  }
 0x135   : > { %v474_v50 = vmul.f32 %v472_v47, %v469_v49  ;;  %v475_v51 = vmul.f32 %v473_v48, %v469_v49 }
 0x137   : > { %v481_v52 = vmul.f32 %v479_v44, %v474_v50  ;;  %v482_v53 = vmul.f32 %v479_v44, %v475_v51 }
 0x139   : > { %v488_v56 = vadd.f32 %v486_v54, %v481_v52  ;;  %v489_v57 = vadd.f32 %v486_v54, %v482_v53 }
 0x13b   : > { %v518_v58 = vmul.f32 %v516_v55, %v488_v56  ;;  %v519_v59 = vmul.f32 %v516_v55, %v489_v57  ;;  %v656_v56 = vlaneseq  ;;  %v852_v57 = vld [vmem:[%s1649_s8] sm:$0xf] }
 0x13d   : > { %v520_v60 = vsub.f32 0.0, %v518_v58  ;;  %v521_v61 = vsub.f32 0.0, %v519_v59 }
 0x13f   : > { %v522_v62 = vmul.f32 1.442695, %v520_v60  ;;  %v524_v63 = vmul.f32 1.442695, %v521_v61  ;;  %v657_v61 = vand.u32 127, %v656_v56 }
 0x141   : > { %1238 = vpow2.f32 %v522_v62 }
 0x142   : > { %1240 = vpow2.f32 %v524_v63 }
 0x147   : > { %v1239_v0 = vpop.eup %1238 }
 0x148   : > { %v1241_v3 = vpop.eup %1240  ;;  %v526_v4 = vadd.f32 1.0, %v1239_v0 }
 0x149   : > { %v527_v5 = vadd.f32 1.0, %v1241_v3  ;;  %v658_v3 = vadd.s32 128, %v657_v61 }
 0x14a   : > { %1242 = vrcp.f32 %v526_v4  ;;  %v539_v12 = vand.u32 2147483648, %v526_v4  ;;  %v537_v14 = vand.u32 2147483647, %v526_v4  ;;  %vm533_vm11 = vweird.f32 %v526_v4 }
 0x14b   : > { %1244 = vrcp.f32 %v527_v5  ;;  %v554_v15 = vand.u32 2147483648, %v527_v5  ;;  %v552_v17 = vand.u32 2147483647, %v527_v5  ;;  %vm548_vm13 = vweird.f32 %v527_v5 }
 0x14c   : > { %v540_v19 = vor.u32 1.1754944e-38, %v539_v12  ;;  %vm538_vm14 = vcmp.eq.f32.partialorder %v537_v14, 8.507059e+37 }
 0x14d   : > { %v555_v22 = vor.u32 1.1754944e-38, %v554_v15  ;;  %vm553_vm0 = vcmp.eq.f32.partialorder %v552_v17, 8.507059e+37 }
 0x150   : > { %v1243_v6 = vpop.eup %1242 }
 0x151   : > { %v1245_v7 = vpop.eup %1244  ;;  %v529_v8 = vmul.f32 %v1243_v6, %v526_v4  ;;  %vm534_vm9 = vweird.f32 %v1243_v6 }
 0x152   : > { %v544_v9 = vmul.f32 %v1245_v7, %v527_v5  ;;  %vm549_vm10 = vweird.f32 %v1245_v7  ;;  %vm535_vm12 = vmor %vm533_vm11, %vm534_vm9  ;;  %vm749_vm9 = vcmask 908288  }
 0x153   : > { %v530_v10 = vsub.f32 1.0, %v529_v8  ;;  %vm550_vm15 = vmor %vm548_vm13, %vm549_vm10  ;;  %vm667_vm13 = vcmask 138240  }
 0x154   : > { %v545_v11 = vsub.f32 1.0, %v544_v9 }
 0x155   : > { %v531_v13 = vmul.f32 %v1243_v6, %v530_v10  ;;  %v660_v10 = vand.u32 15, %v658_v3 }
 0x156   : > { %v546_v16 = vmul.f32 %v1245_v7, %v545_v11 }
 0x157   : > { %v532_v18 = vadd.f32 %v1243_v6, %v531_v13  ;;  %vm1504_vm11 = vcmp.le.s32.totalorder %v660_v10, 14 }
 0x158   : > { %v547_v20 = vadd.f32 %v1245_v7, %v546_v16 }
 0x159   : > { %v536_v21 = vsel %vm535_vm12, %v1243_v6, %v532_v18  ;;  %v659_v6 = vand.u32 15, %v657_v61  ;;  %vm692_vm12 = vcmask 121856  }
 0x15a   : > { %v541_v23 = vsel %vm538_vm14, %v540_v19, %v536_v21  ;;  %v551_v24 = vsel %vm550_vm15, %v1245_v7, %v547_v20  ;;  %v809_v7 = vld [vmem:[%s1648_s7] sm:$0xff]  ;;  %vm730_vm15 = vcmask 924672  }
 0x15b   : > { %vm558_vm2 = vcmp.gt.f32.partialorder %v541_v23, 0.5  ;;  %v556_v25 = vsel %vm553_vm0, %v555_v22, %v551_v24  ;;  %vm1500_vm10 = vcmp.le.s32.totalorder %v659_v6, 14  ;;  %vm1517_vm14 = vcmp.ge.s32.totalorder %v659_v6, 1 }
 0x15c   : > { %v560_v26 = vsel %vm558_vm2, 1.0, %v541_v23  ;;  %v562_v27 = vsel %vm558_vm2, 0.0, %v541_v23  ;;  %vm559_vm3 = vcmp.gt.f32.partialorder %v556_v25, 0.5  ;;  %vm684_vm0 = vcmask 130048  }
 0x15d   : > { %v566_v28 = vmul.f32 %v562_v27, %v1435_v1  ;;  %v561_v29 = vsel %vm559_vm3, 1.0, %v556_v25  ;;  %v563_v30 = vsel %vm559_vm3, 0.0, %v556_v25  ;;  %v564_v32 = vmul.f32 %v560_v26, %v1435_v1  ;;  %v576_v1 = vld [vmem:[%s1645_s4] sm:$0x1] }
 0x15e   : > { %v567_v31 = vmul.f32 %v563_v30, %v1437_v2  ;;  %v565_v34 = vmul.f32 %v561_v29, %v1437_v2  ;;  %vm1523_vm2 = vcmp.ge.s32.totalorder %v660_v10, 1  ;;  %vm741_vm3 = vcmask 916480  }
 0x15f   : > { %v570_v33 = vrot.slane %v566_v28, 4 }
 0x160   : > { %v571_v35 = vrot.slane %v567_v31, 4 }
 0x161   : > { %v574_v36 = vadd.f32 %v570_v33, %v564_v32 }
 0x162   : > { %v575_v37 = vadd.f32 %v571_v35, %v565_v34 }
 0x163   : > { %v577_v38 = vpack.c.bf16 %v574_v36, %v574_v36 }
 0x164   : > { %v578_v39 = vpack.c.bf16 %v575_v37, %v575_v37 }
 0x165   : > { %v585_v40 = vsel %vm583_vm4, %v577_v38, 0  ;;  %v619_v41 = vrot.slane %v577_v38, 2 }
 0x166   : > { %597 = vmatpush.bf16.msra.mxu0 %v585_v40  ;;  %v588_v42 = vsel %vm583_vm4, %v578_v39, 0  ;;  %v620_v43 = vrot.slane %v578_v39, 2 }
 0x167   : > { %610 = vmatpush.bf16.msra.mxu1 %v588_v42  ;;  %v625_v2 = vsel %vm583_vm4, %v619_v41, 0 }
 0x168   : > { %637 = vmatpush.bf16.msra.mxu2 %v625_v2  ;;  %v628_v44 = vsel %vm583_vm4, %v620_v43, 0 }
 0x169   : > { %650 = vmatpush.bf16.msra.mxu3 %v628_v44  ;;  %1120 = vmatmul.msk.bf16.vlgmr.msra.gmra.mxu0 %vm579_vm5, %v576_v1 }
 0x16a   : > { %1121 = vmatmul.msk.bf16.vlgmr.msra.gmra.mxu1 %vm579_vm5, %v576_v1 }
 0x16b   : > { %1122 = vmatmul.msk.bf16.vlgmr.msra.gmra.mxu2 %vm579_vm5, %v616_v45 }
 0x16c   : > { %1123 = vmatmul.msk.bf16.vlgmr.msra.gmra.mxu3 %vm579_vm5, %v616_v45  ;;  %vm792_vm5 = vcmask 1043456  }
 0x1e6   : > { %v1471_v46 = vpop.f32.mrf.mxu0 }
 0x1e7   : > { %v1473_v47 = vpop.f32.mrf.mxu1  ;;  %v853_v48 = vpack.c.bf16 %v1471_v46, %v1471_v46 }
 0x1e8   : > { %v1203_v49 = vpack.i.bf16 %v1473_v47, %v1471_v46  ;;  %v854_v50 = vpack.c.bf16 %v1473_v47, %v1473_v47 }
 0x1e9   : > { %v860_v51 = vsel %vm819_vm6, %v853_v48, 0 }
 0x1ea   : > { %1204 = vrot.lane.b32.xlu1 %v1203_v49, %s1319_s29  ;;  %1199 = vrot.lane.b32.xlu0 %v1203_v49, %s1320_s30  ;;  %v863_v52 = vsel %vm819_vm6, %v854_v50, 0  ;;  %s1274_s29 = scalar_lea.hbm %s1651_s10, 32 }
 0x1eb   : > { %1194 = vrot.lane.b32.xlu2 %v1203_v49, %s1321_s11  ;;  %872 = vmatpush.bf16.msrb.mxu2 %v860_v51  ;;  %s1045_s11 = scalar_lea.hbm %s1651_s10, %s1136_s28 }
 0x1ec   : > { %885 = vmatpush.bf16.msrb.mxu3 %v863_v52 }
 0x1ee   : > { %v601_v53 = vpop.f32.mrf.mxu0  ;;  %1126 = vmatmul.msk.bf16.vlgmr.msrb.gmra.mxu2 %vm855_vm7, %v852_v57  ;;  %v1488_v59 = vpop.f32.mrf.mxu2 }
 0x1ef   : > { %v614_v54 = vpop.f32.mrf.mxu1  ;;  %1127 = vmatmul.msk.bf16.vlgmr.msrb.gmra.mxu3 %vm855_vm7, %v852_v57  ;;  %v1490_v60 = vpop.f32.mrf.mxu3  ;;  %v941_v62 = vsel %vm583_vm4, %v1488_v59, 0.0 }
 0x1f0   : > { %v942_v63 = vsel %vm583_vm4, %v1490_v60, 0.0 }
 0x1f1   : > { %v943_v0 = vadd.f32 %v942_v63, %v941_v62 }
 0x1f2   : > { %1214 = vrot.lane.b32.xlu1 %v1203_v49, %s1322_s12  ;;  %812 = vperm.xlu0 %1233, %v809_v7   ;;  %s352_s12 = scalar_lea.vmem [#allocation2], %s1113_s27 }
 0x1f3   : > { %1209 = vrot.lane.b32.xlu2 %v1203_v49, %s1323_s18  ;;  %s1047_s17 = sshll.u32 %s352_s12, 4  ;;  %s1049_s18 = sshll.u32 %s1045_s11, 4  ;;  %s1048_s17 = int_to_ptr.vmem [resolvable:$true] %s1047_s17  ;;  %s1050_s18 = int_to_ptr.hbm [resolvable:$true] %s1049_s18 }
 0x1f6   : > { %v641_v8 = vpop.f32.mrf.mxu2 }
 0x1f7   : > { %v654_v9 = vpop.f32.mrf.mxu3  ;;  %v894_v8 = vpack.c.bf16 %v1488_v59, %v1488_v59 }
 0x1f8   : > { %v895_v9 = vpack.c.bf16 %v1490_v60, %v1490_v60 }
 0x1fa   : > { %1224 = vrot.lane.b32.xlu1 %v1203_v49, %s1324_s20 }
 0x1fb   : > { %1219 = vrot.lane.b32.xlu2 %v1203_v49, %s1325_s21 }
 0x203   : > { %1229 = vrot.lane.b32.xlu2 %v1203_v49, %s1326_s25 }
 0x22c   : > { %944 = vadd.xlane.f32.xlu2 %v943_v0 }
 0x245   : > { %v1195_v55 = vpop.permute.xlu2 %1194 }
 0x246   : > { %v1197_v4 = vunpack.i.h.bf16 %v1195_v55  ;;  %v1196_v5 = vunpack.i.l.bf16 %v1195_v55 }
 0x248   : > { %v720_v13 = vsel %vm719_vm8, %v1196_v5, %v1197_v4  ;;  %v723_v21 = vsel %vm719_vm8, %v1197_v4, 0.0  ;;  %vm795_vm8 = vcmask 1045504  }
 0x249   : > { %v724_v22 = vsel %vm1500_vm10, %v720_v13, 0.0  ;;  %v725_v29 = vsel %vm1504_vm11, %v723_v21, 0.0 }
 0x24a   : > { %v775_v30 = vrot.slane %v724_v22, 6  ;;  %v776_v40 = vrot.slane %v725_v29, 6 }
 0x24c   : > { %v798_v50 = vsel %vm583_vm4, %v1471_v46, %v775_v30  ;;  %v799_v57 = vsel %vm583_vm4, %v1473_v47, %v776_v40 }
 0x24d   : > { %v1210_v58 = vpop.permute.xlu2 %1209 }
 0x24e   : > { %v1212_v25 = vunpack.i.h.bf16 %v1210_v58  ;;  %v1211_v26 = vunpack.i.l.bf16 %v1210_v58 }
 0x250   : > { %v693_v41 = vsel %vm692_vm12, %v1211_v26, %v1212_v25  ;;  %v696_v42 = vsel %vm692_vm12, 0.0, %v1211_v26 }
 0x251   : > { %v703_v51 = vsel %vm1500_vm10, %v696_v42, 0.0  ;;  %v704_v52 = vsel %vm1504_vm11, %v693_v41, 0.0 }
 0x252   : > { %v763_v63 = vrot.slane %v703_v51, 4  ;;  %v764_v0 = vrot.slane %v704_v52, 4 }
 0x255   : > { %v1220_v15 = vpop.permute.xlu2 %1219 }
 0x256   : > { %v1222_v43 = vunpack.i.h.bf16 %v1220_v15  ;;  %v1221_v1 = vunpack.i.l.bf16 %v1220_v15 }
 0x258   : > { %v668_v46 = vsel %vm667_vm13, %v1221_v1, %v1222_v43  ;;  %v671_v58 = vsel %vm667_vm13, 0.0, %v1221_v1 }
 0x259   : > { %v678_v47 = vsel %vm1517_vm14, %v671_v58, 0.0 }
 0x25c   : > { %v1205_v11 = vpop.permute.xlu1 %1204  ;;  %v1200_v12 = vpop.permute.xlu0 %1199 }
 0x25d   : > { %v1202_v16 = vunpack.i.h.bf16 %v1200_v12  ;;  %v1201_v17 = vunpack.i.l.bf16 %v1200_v12  ;;  %v1207_v32 = vunpack.i.h.bf16 %v1205_v11  ;;  %v1206_v33 = vunpack.i.l.bf16 %v1205_v11  ;;  %v1230_v2 = vpop.permute.xlu2 %1229 }
 0x25e   : > { %v1232_v55 = vunpack.i.h.bf16 %v1230_v2  ;;  %v1231_v56 = vunpack.i.l.bf16 %v1230_v2  ;;  %v679_v12 = vsel %vm1523_vm2, %v668_v46, 0.0 }
 0x25f   : > { %v750_v18 = vsel %vm749_vm9, %v1201_v17, %v1202_v16  ;;  %v753_v19 = vsel %vm749_vm9, %v1202_v16, 0.0  ;;  %v685_v48 = vsel %vm684_vm0, %v1206_v33, %v1207_v32  ;;  %v687_v49 = vsel %vm684_vm0, 0.0, %v1206_v33 }
 0x260   : > { %v754_v23 = vsel %vm1500_vm10, %v750_v18, 0.0  ;;  %v755_v24 = vsel %vm1504_vm11, %v753_v19, 0.0  ;;  %v757_v61 = vrot.slane %v687_v49, 6  ;;  %v758_v62 = vrot.slane %v685_v48, 6 }
 0x261   : > { %v806_v27 = vpack.c.bf16 %v754_v23, %v754_v23  ;;  %v807_v28 = vpack.c.bf16 %v755_v24, %v755_v24  ;;  %v744_v10 = vsel %vm741_vm3, %v1232_v55, 0.0  ;;  %v742_v11 = vsel %vm741_vm3, %v1231_v56, %v1232_v55 }
 0x262   : > { %v790_v15 = vsel %vm583_vm4, %v678_v47, %v757_v61  ;;  %v791_v16 = vsel %vm583_vm4, %v679_v12, %v758_v62  ;;  %v787_v21 = vrot.slane %v744_v10, 2  ;;  %v786_v22 = vrot.slane %v742_v11, 2 }
 0x263   : > { %v821_v35 = vsel %vm819_vm6, %v806_v27, 0  ;;  %v824_v36 = vsel %vm819_vm6, %v807_v28, 0  ;;  %v793_v25 = vsel %vm792_vm5, %v790_v15, %v763_v63  ;;  %v794_v26 = vsel %vm792_vm5, %v791_v16, %v764_v0 }
 0x264   : > { %v1215_v34 = vpop.permute.xlu1 %1214  ;;  %832 = vmatpush.bf16.msrb.mxu0 %v821_v35  ;;  %845 = vmatpush.bf16.msrb.mxu1 %v824_v36  ;;  %v900_v33 = vsel %vm819_vm6, %v894_v8, 0  ;;  %v808_v35 = vld [vmem:[%s1647_s6] sm:$0xf]  ;;  %v813_v41 = vpop.permute.xlu0 %812 }
 0x265   : > { %v1217_v38 = vunpack.i.h.bf16 %v1215_v34  ;;  %v1216_v39 = vunpack.i.l.bf16 %v1215_v34  ;;  %v903_v34 = vsel %vm819_vm6, %v895_v9, 0  ;;  %v893_v36 = vld [vmem:[%s1650_s9] sm:$0x7] }
 0x267   : > { %v734_v44 = vsel %vm730_vm15, %v1217_v38, 0.0  ;;  %v731_v45 = vsel %vm730_vm15, %v1216_v39, %v1217_v38 }
 0x268   : > { %v736_v53 = vsel %vm1523_vm2, %v734_v44, 0.0  ;;  %v735_v54 = vsel %vm1517_vm14, %v731_v45, 0.0 }
 0x269   : > { %v782_v3 = vrot.slane %v736_v53, 4  ;;  %v781_v4 = vrot.slane %v735_v54, 4 }
 0x26b   : > { %v800_v18 = vsel %vm792_vm5, %v798_v50, %v781_v4  ;;  %v801_v20 = vsel %vm792_vm5, %v799_v57, %v782_v3 }
 0x26c   : > { %v1225_v5 = vpop.permute.xlu1 %1224  ;;  %v802_v28 = vsel %vm795_vm8, %v800_v18, %v786_v22  ;;  %v803_v30 = vsel %vm795_vm8, %v801_v20, %v787_v21 }
 0x26d   : > { %v1227_v6 = vunpack.i.h.bf16 %v1225_v5  ;;  %v1226_v7 = vunpack.i.l.bf16 %v1225_v5 }
 0x26f   : > { %v709_v13 = vsel %vm490_vm1, %v1226_v7, %v1227_v6  ;;  %v712_v14 = vsel %vm490_vm1, 0.0, %v1226_v7  ;;  %vm815_vm1 = vcmask 146432  }
 0x270   : > { %v713_v17 = vsel %vm1517_vm14, %v712_v14, 0.0  ;;  %v714_v19 = vsel %vm1523_vm2, %v709_v13, 0.0 }
 0x271   : > { %v769_v23 = vrot.slane %v713_v17, 2  ;;  %v770_v24 = vrot.slane %v714_v19, 2  ;;  %v874_v37 = vpop.f32.mrf.mxu2 }
 0x272   : > { %v887_v38 = vpop.f32.mrf.mxu3 }
 0x273   : > { %v796_v27 = vsel %vm795_vm8, %v793_v25, %v769_v23  ;;  %v797_v29 = vsel %vm795_vm8, %v794_v26, %v770_v24 }
 0x274   : > { %v804_v31 = vpack.c.bf16 %v802_v28, %v796_v27  ;;  %v805_v32 = vpack.c.bf16 %v803_v30, %v797_v29 }
 0x276   : > { %833 = vmatpush.bf16.msrb.mxu0 %v804_v31  ;;  %846 = vmatpush.bf16.msrb.mxu1 %v805_v32 }
 0x279   : > { %1124 = vmatmul.msk.bf16.vlgmr.msrb.gmra.mxu0 %vm815_vm1, %v808_v35  ;;  %1125 = vmatmul.msk.bf16.vlgmr.msrb.gmra.mxu1 %vm815_vm1, %v808_v35  ;;  %v876_v39 = vpop.f32.mrf.mxu2 }
 0x27a   : > { %912 = vmatpush.bf16.msra.mxu0 %v900_v33  ;;  %925 = vmatpush.bf16.msra.mxu1 %v903_v34  ;;  %v889_v40 = vpop.f32.mrf.mxu3 }
 0x289   : > { %1128 = vmatmul.msk.bf16.vlgmr.msra.gmra.mxu0 %vm855_vm7, %v893_v36  ;;  %1129 = vmatmul.msk.bf16.vlgmr.msra.gmra.mxu1 %vm855_vm7, %v893_v36 }
 0x29f   : > { %v945_v46 = vpop.xlane.xlu2 %944 }
 0x2a0   : > { %v946_v61 = vmul.f32 0.00390625, %v945_v46 }
 0x2a2   : > { %v964_v0 = vsel %vm583_vm4, %v946_v61, -inf }
 0x2a3   : > { %v965_v5 = vrot.slane %v964_v0, 4 }
 0x2a5   : > { %v966_v8 = vmax.f32 %v964_v0, %v965_v5 }
 0x2a7   : > { %v967_v11 = vrot.slane %v966_v8, 2 }
 0x2a9   : > { %v968_v15 = vmax.f32 %v966_v8, %v967_v11 }
 0x2ab   : > { %v969_v18 = vrot.slane %v968_v15, 1 }
 0x2ad   : > { %v970_v21 = vmax.f32 %v968_v15, %v969_v18 }
 0x2f6   : > { %v835_v42 = vpop.f32.mrf.mxu0  ;;  %v848_v43 = vpop.f32.mrf.mxu1 }
 0x2f7   : > { %v836_v1 = vadd.f32 %v835_v42, %v813_v41  ;;  %v849_v2 = vadd.f32 %v848_v43, %v813_v41 }
 0x2f9   : > { %v1583_v44 = vadd.f32 %v874_v37, %v836_v1  ;;  %v1585_v45 = vadd.f32 %v887_v38, %v849_v2 }
 0x2fb   : > { %v931_v48 = vadd.f32 %v1585_v45, %v1583_v44 }
 0x2fd   : > { %932 = vadd.xlane.f32.xlu0 %v931_v48 }
 0x2fe   : > { %v837_v49 = vpop.f32.mrf.mxu0  ;;  %v850_v50 = vpop.f32.mrf.mxu1 }
 0x306   : > { %v1589_v51 = vpop.f32.mrf.mxu0  ;;  %v1591_v52 = vpop.f32.mrf.mxu1 }
 0x307   : > { %v935_v53 = vsel %vm795_vm8, %v1589_v51, 0.0  ;;  %v936_v54 = vsel %vm795_vm8, %v1591_v52, 0.0 }
 0x308   : > { %v937_v55 = vadd.f32 %v936_v54, %v935_v53 }
 0x30a   : > { %938 = vadd.xlane.f32.xlu1 %v937_v55 }
 0x30e   : > { %v916_v56 = vpop.f32.mrf.mxu0  ;;  %v929_v57 = vpop.f32.mrf.mxu1 }
 0x370   : > { %v933_v58 = vpop.xlane.xlu0 %932 }
 0x371   : > { %v934_v62 = vmul.f32 0.00390625, %v933_v58 }
 0x373   : > { %v947_v63 = vrot.slane %v934_v62, 4 }
 0x375   : > { %v948_v3 = vmax.f32 %v934_v62, %v947_v63 }
 0x377   : > { %v949_v4 = vrot.slane %v948_v3, 2 }
 0x379   : > { %v950_v6 = vmax.f32 %v948_v3, %v949_v4 }
 0x37b   : > { %v951_v7 = vrot.slane %v950_v6, 1 }
 0x37d   : > { %v939_v9 = vpop.xlane.xlu1 %938  ;;  %v952_v47 = vmax.f32 %v950_v6, %v951_v7 }
 0x37e   : > { %v940_v10 = vmul.f32 0.00390625, %v939_v9 }
 0x37f   : > { %1137 = vpush %v952_v47 }
 0x380   : > { %v955_v12 = vsel %vm795_vm8, %v940_v10, -inf }
 0x381   : > { %v956_v13 = vrot.slane %v955_v12, 4 }
 0x383   : > { %v957_v14 = vmax.f32 %v955_v12, %v956_v13 }
 0x385   : > { %v958_v16 = vrot.slane %v957_v14, 2 }
 0x387   : > { %v959_v17 = vmax.f32 %v957_v14, %v958_v16 }
 0x389   : > { %v960_v19 = vrot.slane %v959_v17, 1 }
 0x38b   : > { %v961_v20 = vmax.f32 %v959_v17, %v960_v19 }
 0x38d   : > { %1139 = vpush %v961_v20 }
 0x38e   : > { %1141 = vpush %v970_v21 }
 0x3b0   : > { %s1138_s20 = spop %1137 }
 0x3b1   : > { %v954_v25 = vstv %s1138_s20  ;;  %s1034_s20 = scalar_lea.sflag [#allocation3], %s350_s26 }
 0x3be   : > { %s1140_s21 = spop %1139 }
 0x3bf   : > { %v963_v22 = vstv %s1140_s21  ;;  %s1142_s25 = spop %1141  ;;  %s1268_s21 = sshra.s32 %s1050_s18, 4  ;;  %s1269_s21 = int_to_ptr.hbm [resolvable:$true] %s1268_s21 }
 0x3c0   : > { %v972_v23 = vstv %s1142_s25  ;;  %s1270_s25 = scalar_lea.hbm %s1269_s21, 16  ;;  %p1275_p0 = scmp.lt.s32.totalorder %s1269_s21, %s1651_s10 }
 0x3c1   : > { %v973_v24 = vmax.f32 %v963_v22, %v972_v23  ;;  %p1271_p11 = scmp.ne.s32.totalorder %s1269_s21, %s1270_s25  ;;  %p1276_p1 = scmp.lt.s32.totalorder %s1274_s29, %s1270_s25 }
 0x3c3   : > { %v974_v26 = vmax.f32 %v954_v25, %v973_v24  ;;  %p1272_p12 = pnand %p1271_p11, %p1420_p5  ;;  %p1277_p2 = por %p1276_p1, %p1275_p0 }
 0x3c5   : > { %v975_v27 = vsub.f32 %v934_v62, %v974_v26  ;;  %v978_v28 = vsub.f32 %v940_v10, %v974_v26  ;;  %v981_v29 = vsub.f32 %v946_v61, %v974_v26  ;;  %p1273_p13 = pneg %p1272_p12 }
 0x3c7   : > { %v976_v30 = vmul.f32 1.442695, %v975_v27  ;;  %v979_v31 = vmul.f32 1.442695, %v978_v28  ;;  %v982_v32 = vmul.f32 1.442695, %v981_v29  ;;  %p1278_p3 = pnand %p1277_p2, %p1273_p13 }
 0x3c9   : > { %1246 = vpow2.f32 %v976_v30 }
 0x3ca   : > { %1248 = vpow2.f32 %v979_v31 }
 0x3cb   : > { %1250 = vpow2.f32 %v982_v32 }
 0x3cf   : > { %v1247_v33 = vpop.eup %1246 }
 0x3d0   : > { %v1249_v34 = vpop.eup %1248  ;;  %v984_v35 = vrot.slane %v1247_v33, 4 }
 0x3d1   : > { %v1251_v36 = vpop.eup %1250  ;;  %v990_v37 = vsel %vm795_vm8, %v1249_v34, 0.0 }
 0x3d2   : > { %v985_v38 = vadd.f32 %v1247_v33, %v984_v35  ;;  %v991_v39 = vrot.slane %v990_v37, 4  ;;  %v998_v40 = vsel %vm583_vm4, %v1251_v36, 0.0 }
 0x3d3   : > { %v999_v41 = vrot.slane %v998_v40, 4 }
 0x3d4   : > { %v986_v42 = vrot.slane %v985_v38, 2  ;;  %v992_v43 = vadd.f32 %v991_v39, %v990_v37 }
 0x3d5   : > { %v1000_v1 = vadd.f32 %v999_v41, %v998_v40 }
 0x3d6   : > { %v987_v2 = vadd.f32 %v986_v42, %v985_v38  ;;  %v993_v48 = vrot.slane %v992_v43, 2 }
 0x3d7   : > { %v1001_v49 = vrot.slane %v1000_v1, 2 }
 0x3d8   : > { %v988_v50 = vrot.slane %v987_v2, 1  ;;  %v994_v53 = vadd.f32 %v993_v48, %v992_v43 }
 0x3d9   : > { %v1002_v54 = vadd.f32 %v1001_v49, %v1000_v1 }
 0x3da   : > { %v989_v55 = vadd.f32 %v988_v50, %v987_v2  ;;  %v995_v56 = vrot.slane %v994_v53, 1 }
 0x3db   : > { %v1003_v57 = vrot.slane %v1002_v54, 1 }
 0x3dc   : > { %v996_v46 = vadd.f32 %v995_v56, %v994_v53 }
 0x3dd   : > { %v1004_v61 = vadd.f32 %v1003_v57, %v1002_v54 }
 0x3de   : > { %v997_v58 = vadd.f32 %v996_v46, %v989_v55 }
 0x3e0   : > { %v1005_v62 = vadd.f32 %v1004_v61, %v997_v58 }
 0x3e2   : > { %1252 = vrcp.f32 %v1005_v62 }
 0x3e8   : > { %v1253_v63 = vpop.eup %1252 }
 0x3e9   : > { %v1007_v0 = vmul.f32 %v1253_v63, %v1005_v62 }
 0x3eb   : > { %v1008_v3 = vsub.f32 2.0, %v1007_v0 }
 0x3ed   : > { %v1009_v4 = vmul.f32 %v1253_v63, %v1008_v3 }
 0x3ef   : > { %v1018_v5 = vmul.f32 %v1251_v36, %v1009_v4  ;;  %v1010_v6 = vmul.f32 %v1247_v33, %v1009_v4  ;;  %v1013_v7 = vmul.f32 %v1249_v34, %v1009_v4 }
 0x3f1   : > { %v1011_v8 = vmul.f32 %v1010_v6, %v1583_v44  ;;  %v1012_v9 = vmul.f32 %v1010_v6, %v1585_v45  ;;  %v1014_v47 = vmul.f32 %v1013_v7, %v1589_v51  ;;  %v1015_v10 = vmul.f32 %v1013_v7, %v1591_v52 }
 0x3f2   : > { %v1019_v11 = vmul.f32 %v1018_v5, %v1488_v59  ;;  %v1020_v12 = vmul.f32 %v1018_v5, %v1490_v60 }
 0x3f3   : > { %v1016_v44 = vadd.f32 %v1014_v47, %v1011_v8  ;;  %v1017_v45 = vadd.f32 %v1015_v10, %v1012_v9 }
 0x3f4   : > { %v1023_v13 = vrot.slane %v1019_v11, 2  ;;  %v1024_v14 = vrot.slane %v1020_v12, 2 }
 0x3f6   : > { %v1027_v15 = vadd.f32 %v1023_v13, %v1011_v8  ;;  %v1028_v51 = vadd.f32 %v1024_v14, %v1012_v9 }
 0x3f8   : > { %v1029_v52 = vsel %vm795_vm8, %v1016_v44, %v1027_v15  ;;  %v1030_v59 = vsel %vm795_vm8, %v1017_v45, %v1028_v51 }
 0x3f9   : > { %1031 = vst [vmem:[%s352_s12] sm:$0xff] %v1029_v52 }
 0x3fa   : > { %1032 = vst [vmem:[%s352_s12 + $0x8] sm:$0xff] %v1030_v59 }
 0x3fb   : > { %1281 = shalt.err (!%p1278_p3)
}
 0x3fc   : > { %1143 = dma.vmem_to_hbm [thread:$0]  (%p1420_p5), %s1048_s17, 256, %s1050_s18, %s1034_s20  }
 0x3fd PF: > { %p1149_p4 = scmp.ge.s32.totalorder %s1316_s16, 2  ;;  %s1061_s26 = sand.u32 1, %s1304_s13  }
 0x3fe   : > { %s1062_s12 = scalar_lea.sflag [#allocation3], %s1061_s26 }
 0x3ff   : > { %p1146_p7 = pnand %p1149_p4, %p1424_p6 }
 0x401   : > { %p1147_p8 = pneg %p1146_p7 }
 0x403   : > { %1299 = dma.done.wait (%p1147_p8), %s1062_s12, 256  }
 0x404   : > { %1301 = vsyncadd (%p1147_p8), %s1062_s12, 4294967040  ;;  %p20_p9 = scmp.ge.s32.totalorder %s1407_s19, 4   ;;  %s1662_s13 = smov %s1308_s14 }
 0x405   : > { %s1663_s14 = smov %s1312_s15  ;;  %s1664_s15 = smov %s1418_s22 }
 0x406   : > { %s1665_s16 = smov %s1407_s19  ;;  %22 = sbr.rel (!%p20_p9) target bundleno = 3 (0x3), region = 95 }
 0x40b   :  { %1068 = vsyncpa [#allocation3], 1 }
 0x40c   :  { %1070 = vsyncpa [#allocation3 + $0x1], 1 }

</bundles_post_ra>
